<compile_context>
chip_gen: v6e
topology: v6e:2x2x1
jax: 0.10.0
libtpu: 0.0.40
codegen_flags: <defaults>
</compile_context>

<pallas_src>
import functools

import jax
import jax.numpy as jnp
from jax import lax
from jax.experimental import pallas as pl
from jax.experimental.pallas import tpu as pltpu


def _round_up(x, m):
    return ((x + m - 1) // m) * m


def _cdiv(a, b):
    return -(-a // b)


def _vmem_budget_bytes():
    """Per-core VMEM limit to request (~75% of physical)."""
    phys = 64 * 1024 * 1024  # conservative fallback = v7x per-TC VMEM
    try:
        info = pltpu.get_tpu_info()
        phys = int(getattr(info, "vmem_capacity_bytes", phys))
    except Exception:
        pass
    return (phys * 3) // 4  # 48 MiB on v7x, 96 MiB on v5e/v6e


def _select_tiles(Mp, Np, K, budget, in_itemsize, out_itemsize, sub):
    """Static (Python-int) tile selection that fits the per-core VMEM budget."""

    def footprint(tm, tn, tk):
        k_tiled = tk < K
        f = 2 * tm * tk * in_itemsize          # x tile, double-buffered
        f += 2 * tn * tk * in_itemsize         # weight strip, double-buffered
        f += 2 * tn * 4                        # bias row
        f += 2 * tm * tn * out_itemsize        # output tile, double-buffered
        if k_tiled:
            f += tm * tn * 4                   # f32 accumulator scratch
        f += 1 << 20                           # compiler-internal headroom
        return f

    target = (budget * 17) // 20               # ~85% of the requested limit

    tm = min(512, Mp)                          # amortize ~0.35us/step overhead
    tn = Np                                    # prefer one resident weight strip
    tk = K                                     # full-K strips unless too big

    while footprint(tm, tn, tk) > target:
        if tm > 256:
            tm = _round_up(tm // 2, sub)
        elif tk > 1024:
            tk = _round_up(tk // 2, 128)       # start tiling the contraction dim
        elif tn > 512:
            tn = _round_up(tn // 2, 128)
        elif tk > 256:
            tk = _round_up(tk // 2, 128)
        elif tm > 128:
            tm = _round_up(tm // 2, sub)
        elif tn > 128:
            tn = _round_up(tn // 2, 128)
        elif tk > 128:
            tk = _round_up(tk // 2, 128)
        elif tm > sub:
            tm = _round_up(tm // 2, sub)
        else:
            break
    return tm, tn, tk


def _make_fused_kernel(activation):
    # Single full-K strip: matmul + bias + activation fused, no scratch.
    def kernel(x_ref, w_ref, b_ref, o_ref):
        # x_ref: (tm, K)  w_ref: (tn, K)  b_ref: (1, tn)  o_ref: (tm, tn)
        acc = lax.dot_general(
            x_ref[...], w_ref[...],
            dimension_numbers=(((1,), (1,)), ((), ())),   # contract last dims
            preferred_element_type=jnp.float32)
        o_ref[...] = activation(acc + b_ref[...]).astype(o_ref.dtype)
    return kernel


def _make_ktiled_kernel(activation):
    # K is tiled on the innermost ("arbitrary") grid axis -> f32 accumulator.
    def kernel(x_ref, w_ref, b_ref, o_ref, acc_ref):
        k = pl.program_id(2)

        @pl.when(k == 0)
        def _():
            acc_ref[...] = jnp.zeros_like(acc_ref)

        acc_ref[...] += lax.dot_general(
            x_ref[...], w_ref[...],
            dimension_numbers=(((1,), (1,)), ((), ())),
            preferred_element_type=jnp.float32)

        @pl.when(k == pl.num_programs(2) - 1)
        def _():
            o_ref[...] = activation(acc_ref[...] + b_ref[...]).astype(o_ref.dtype)
    return kernel


@functools.partial(jax.jit, static_argnames=("activation", "use_bf16_inputs"))
def shl_feature_model(x, weight, bias, *, activation=jnp.tanh, use_bf16_inputs=True):
    """activation(x @ weight.T + bias) via a tiled Pallas TPU kernel.

    x: (batch, input_dim), weight: (width, input_dim), bias: (width,).
    Streams bf16 operands through the MXU with an f32 accumulator and an f32
    bias-add + activation epilogue (set use_bf16_inputs=False for full f32).
    """
    M, K = x.shape
    N, Kw = weight.shape
    assert K == Kw, "input_dim mismatch between x and weight"
    assert bias.shape == (N,), "bias must have shape (width,)"

    in_dtype = jnp.bfloat16 if use_bf16_inputs else x.dtype
    in_itemsize = jnp.dtype(in_dtype).itemsize
    out_dtype = x.dtype
    out_itemsize = jnp.dtype(out_dtype).itemsize
    sub = 16 if in_itemsize == 2 else 8            # sublane granule (bf16 packs 2/row)

    budget = _vmem_budget_bytes()

    # ---- tile selection (all static ints) -----------------------------------
    Mp = _round_up(M, sub)
    Np = _round_up(N, 128)
    tm, tn, tk = _select_tiles(Mp, Np, K, budget, in_itemsize, out_itemsize, sub)

    # Re-balance tiles so per-axis padding stays below one granule.
    num_m = _cdiv(Mp, tm); tm = _round_up(_cdiv(Mp, num_m), sub); Mp = num_m * tm
    num_n = _cdiv(Np, tn); tn = _round_up(_cdiv(Np, num_n), 128); Np = num_n * tn
    if tk < K:
        num_k = _cdiv(K, tk); tk = _round_up(_cdiv(K, num_k), 128); Kp = num_k * tk
    else:
        num_k = 1; tk = K; Kp = K

    # ---- wrapper-side layout prep (zero-pad is numerically safe: padded rows/
    # cols are sliced away, padded K contributes 0 to the dot product) --------
    xk = x
    if Mp != M or Kp != K:
        xk = jnp.pad(xk, ((0, Mp - M), (0, Kp - K)))
    wk = weight
    if Np != N or Kp != K:
        wk = jnp.pad(wk, ((0, Np - N), (0, Kp - K)))
    bk = bias if Np == N else jnp.pad(bias, (0, Np - N))
    if use_bf16_inputs:
        xk = xk.astype(jnp.bfloat16)
        wk = wk.astype(jnp.bfloat16)
    bk2 = bk.astype(jnp.float32).reshape(1, Np)

    # ---- adaptive grid order: keep the operand that would otherwise be
    # re-streamed the most resident on the outer axis --------------------------
    weight_resident = (num_n - 1) * Mp <= (num_m - 1) * Np

    if num_k == 1:
        kernel = _make_fused_kernel(activation)
        scratch = []
        if weight_resident:
            grid = (num_n, num_m)
            x_map = lambda n, m: (m, 0)
            w_map = lambda n, m: (n, 0)
            b_map = lambda n, m: (0, n)
            o_map = lambda n, m: (m, n)
        else:
            grid = (num_m, num_n)
            x_map = lambda m, n: (m, 0)
            w_map = lambda m, n: (n, 0)
            b_map = lambda m, n: (0, n)
            o_map = lambda m, n: (m, n)
        semantics = ("parallel", "parallel")
    else:
        kernel = _make_ktiled_kernel(activation)
        scratch = [pltpu.VMEM((tm, tn), jnp.float32)]
        if weight_resident:
            grid = (num_n, num_m, num_k)
            x_map = lambda n, m, k: (m, k)
            w_map = lambda n, m, k: (n, k)
            b_map = lambda n, m, k: (0, n)
            o_map = lambda n, m, k: (m, n)
        else:
            grid = (num_m, num_n, num_k)
            x_map = lambda m, n, k: (m, k)
            w_map = lambda m, n, k: (n, k)
            b_map = lambda m, n, k: (0, n)
            o_map = lambda m, n, k: (m, n)
        semantics = ("parallel", "parallel", "arbitrary")

    cost = pl.CostEstimate(
        flops=2 * Mp * Np * Kp,
        transcendentals=Mp * Np,
        bytes_accessed=(Mp * Kp + Np * Kp) * in_itemsize + Np * 4 + Mp * Np * out_itemsize,
    )

    out = pl.pallas_call(
        kernel,
        out_shape=jax.ShapeDtypeStruct((Mp, Np), out_dtype),
        grid_spec=pltpu.PrefetchScalarGridSpec(
            num_scalar_prefetch=0,
            grid=grid,
            in_specs=[
                pl.BlockSpec((tm, tk), x_map),   # x streamed, lane dim = K-strip
                pl.BlockSpec((tn, tk), w_map),   # weight in native (N, K) layout
                pl.BlockSpec((1, tn), b_map),
            ],
            out_specs=pl.BlockSpec((tm, tn), o_map),
            scratch_shapes=scratch,
        ),
        compiler_params=pltpu.CompilerParams(
            dimension_semantics=semantics,
            vmem_limit_bytes=budget,
            allow_input_fusion=[True, True, True],
        ),
        cost_estimate=cost,
    )(xk, wk, bk2)

    if Mp != M or Np != N:
        out = out[:M, :N]
    return out


def _reference(x, weight, bias):
    return jnp.tanh(x @ weight.T + bias[None, :])


if __name__ == "__main__":
    # Small shapes consistent with the module; intentionally NOT tile-aligned
    # so the padding/rebalancing path is exercised.
    batch, input_dim, width = 10, 32, 192

    key = jax.random.PRNGKey(0)
    kx, kw, kb = jax.random.split(key, 3)

    x = jax.random.normal(kx, (batch, input_dim), dtype=jnp.float32)
    # Parameter init mirroring __init__: weight ~ randn(width, input_dim),
    # bias = zeros(width).
    weight = jax.random.normal(kw, (width, input_dim), dtype=jnp.float32)
    bias = jnp.zeros((width,), dtype=jnp.float32)

    # --- default bf16-streamed path: compare against same-precision reference
    out = shl_feature_model(x, weight, bias)
    out = jax.block_until_ready(out)
    assert out.shape == (batch, width)

    xq = x.astype(jnp.bfloat16).astype(jnp.float32)
    wq = weight.astype(jnp.bfloat16).astype(jnp.float32)
    ref_bf16 = jnp.tanh(xq @ wq.T + bias[None, :])
    assert jnp.allclose(out, ref_bf16, atol=2e-3, rtol=2e-3), "bf16-path mismatch"
    # and loosely against the full-precision reference
    assert jnp.allclose(out, _reference(x, weight, bias), atol=5e-2), "bf16 drift"

    # --- full f32 path (exercises the bias-add with a nonzero bias) ----------
    bias_rnd = 0.1 * jax.random.normal(kb, (width,), dtype=jnp.float32)
    out_f32 = shl_feature_model(x, weight, bias_rnd, use_bf16_inputs=False)
    out_f32 = jax.block_until_ready(out_f32)
    assert jnp.allclose(out_f32, _reference(x, weight, bias_rnd),
                        atol=1e-5, rtol=1e-5), "f32-path mismatch"

    print("KERNEL_OK")
</pallas_src>

<mosaic_0001>
module attributes {stable_mosaic.version = 11 : i64} {
  func.func @kernel(%arg0: i32, %arg1: i32, %arg2: memref<16x32xbf16, #tpu.memory_space<vmem>>, %arg3: memref<256x32xbf16, #tpu.memory_space<vmem>>, %arg4: memref<1x256xf32, #tpu.memory_space<vmem>>, %arg5: memref<16x256xf32, #tpu.memory_space<vmem>>) attributes {dimension_semantics = [#tpu.dimension_semantics<parallel>, #tpu.dimension_semantics<parallel>], iteration_bounds = array<i64: 1, 1>, scalar_prefetch = 0 : i64, scratch_operands = 0 : i64, tpu.core_type = #tpu.core_type<tc>, window_params = [{transform_indices = @transform_0, window_bounds = array<i64: 16, 32>}, {transform_indices = @transform_1, window_bounds = array<i64: 256, 32>}, {transform_indices = @transform_2, window_bounds = array<i64: 1, 256>}, {transform_indices = @transform_3, window_bounds = array<i64: 16, 256>}]} {
    %c0 = arith.constant 0 : index
    %c0_0 = arith.constant 0 : index
    %0 = vector.load %arg2[%c0, %c0_0] : memref<16x32xbf16, #tpu.memory_space<vmem>>, vector<16x32xbf16>
    %c0_1 = arith.constant 0 : index
    %c0_2 = arith.constant 0 : index
    %1 = vector.load %arg3[%c0_1, %c0_2] : memref<256x32xbf16, #tpu.memory_space<vmem>>, vector<256x32xbf16>
    %cst = arith.constant dense<0.000000e+00> : vector<16x256xf32>
    %2 = tpu.matmul %0, %1, %cst {dimension_numbers = #tpu.dot_dimension_numbers<[1], [1], [0], [0], [0, 0, 1, 0], [], []>} : vector<16x32xbf16>, vector<256x32xbf16>, vector<16x256xf32> -> vector<16x256xf32>
    %c0_3 = arith.constant 0 : index
    %c0_4 = arith.constant 0 : index
    %3 = vector.load %arg4[%c0_3, %c0_4] : memref<1x256xf32, #tpu.memory_space<vmem>>, vector<1x256xf32>
    %4 = vector.broadcast %3 : vector<1x256xf32> to vector<16x256xf32>
    %5 = arith.addf %2, %4 : vector<16x256xf32>
    %6 = math.tanh %5 : vector<16x256xf32>
    %c0_5 = arith.constant 0 : index
    %c0_6 = arith.constant 0 : index
    %7 = vector.load %arg5[%c0_5, %c0_6] : memref<16x256xf32, #tpu.memory_space<vmem>>, vector<16x256xf32>
    tpu.vector_store %arg5[%c0_5, %c0_6], %6 {strides = array<i32>} : memref<16x256xf32, #tpu.memory_space<vmem>>, vector<16x256xf32>,
    return
  }
  func.func @transform_0(%arg0: i32, %arg1: i32) -> (i32, i32) {
    %c0_i32 = arith.constant 0 : i32
    %c0_i32_0 = arith.constant 0 : i32
    return %arg1, %c0_i32 : i32, i32
  }
  func.func @transform_1(%arg0: i32, %arg1: i32) -> (i32, i32) {
    %c0_i32 = arith.constant 0 : i32
    %c0_i32_0 = arith.constant 0 : i32
    return %arg0, %c0_i32 : i32, i32
  }
  func.func @transform_2(%arg0: i32, %arg1: i32) -> (i32, i32) {
    %c0_i32 = arith.constant 0 : i32
    %c0_i32_0 = arith.constant 0 : i32
    return %c0_i32, %arg0 : i32, i32
  }
  func.func @transform_3(%arg0: i32, %arg1: i32) -> (i32, i32) {
    %c0_i32 = arith.constant 0 : i32
    return %arg1, %arg0 : i32, i32
  }
}

</mosaic_0001>

<bundles_post_ra>
// kernel: shl_feature_model.2
= control target key start
LH: loop header
LB: loop body
LE: loop exit
PB: predicated region body
PF: predicated region fallthrough
CT: control target
= control target key end

     0   :  { %s1116_s0 = inlined_call_operand.vmem [shape: f32[1,256], index: 0, kind: input, shape index: {}]   ;;  %s1117_s1 = inlined_call_operand.vmem [shape: bf16[192,32], index: 1, kind: input, shape index: {}]   ;;  %s1118_s2 = inlined_call_operand.<no memory space> [shape: bf16[], index: 2, kind: input, shape index: {}]   ;;  %s1119_s3 = inlined_call_operand.vmem [shape: bf16[10,32], index: 3, kind: input, shape index: {}]   ;;  %s1120_s4 = inlined_call_operand.hbm [shape: f32[16,256], index: 4, kind: output, shape index: {}]  }
   0x1   :  { %v9_v0 = vstv %s1118_s2 }
   0x2   :  { %v939_v1 = vunpack.i.l.bf16 %v9_v0 }
   0x3   :  { %vm649_vm0 = vcmask 261120   ;;  %v34_v3 = vlaneseq  ;;  %v782_v4 = vld [vmem:[%s1117_s1 + $0x38] sm:$0xff]   ;;  %v780_v5 = vld [vmem:[%s1117_s1 + $0x30] sm:$0xff]   ;;  %v778_v6 = vld [vmem:[%s1117_s1 + $0x28] sm:$0xff]  }
   0x4   :  { %v813_v2 = vpack.c.bf16 %v939_v1, %v939_v1  ;;  %v267_v7 = vunpack.c.l.bf16 %v782_v4  ;;  %v281_v8 = vunpack.c.h.bf16 %v782_v4  ;;  %v239_v9 = vunpack.c.l.bf16 %v780_v5  ;;  %v776_v11 = vld [vmem:[%s1117_s1 + $0x20] sm:$0xff]   ;;  %v790_v12 = vld [vmem:[%s1117_s1 + $0x58] sm:$0xff]   ;;  %v788_v18 = vld [vmem:[%s1117_s1 + $0x50] sm:$0xff]  }
   0x5   :  { %v253_v10 = vunpack.c.h.bf16 %v780_v5  ;;  %v774_v13 = vld [vmem:[%s1117_s1 + $0x18] sm:$0xff]   ;;  %v962_v14 = vand.u32 127, %v34_v3  ;;  %v211_v15 = vunpack.c.l.bf16 %v778_v6  ;;  %v225_v16 = vunpack.c.h.bf16 %v778_v6 }
   0x6   :  { %829 = vst [vmem:[#allocation15 + $0x78] sm:$0xff] %v813_v2   ;;  %814 = vst [vmem:[#allocation15 + $0x60] sm:$0xff] %v813_v2   ;;  %v183_v17 = vunpack.c.l.bf16 %v776_v11  ;;  %v197_v19 = vunpack.c.h.bf16 %v776_v11  ;;  %v442_v20 = vunpack.c.l.bf16 %v790_v12  ;;  %v465_v21 = vunpack.c.h.bf16 %v790_v12 }
   0x7   :  { %819 = vst [vmem:[#allocation15 + $0x68] sm:$0xff] %v813_v2   ;;  %824 = vst [vmem:[#allocation15 + $0x70] sm:$0xff] %v813_v2   ;;  %v155_v22 = vunpack.c.l.bf16 %v774_v13  ;;  %vm37_vm1 = vcmp.lt.s32.totalorder %v962_v14, 32  ;;  %v169_v23 = vunpack.c.h.bf16 %v774_v13  ;;  %v396_v24 = vunpack.c.l.bf16 %v788_v18 }
   0x8   :  { %v419_v25 = vunpack.c.h.bf16 %v788_v18 }
   0x9   :  { %19 = vsyncpa [#allocation13], 0  ;;  %v273_v26 = vsel %vm37_vm1, %v267_v7, %v939_v1  ;;  %v287_v27 = vsel %vm37_vm1, %v281_v8, %v939_v1  ;;  %v245_v28 = vsel %vm37_vm1, %v239_v9, %v939_v1  ;;  %v259_v29 = vsel %vm37_vm1, %v253_v10, %v939_v1  ;;  %v772_v43 = vld [vmem:[%s1117_s1 + $0x10] sm:$0xff]   ;;  %v786_v44 = vld [vmem:[%s1117_s1 + $0x48] sm:$0xff]   ;;  %s908_s16 = smov [#allocation12]  }
   0xa   :  { %v907_v30 = vmov 0.0   ;;  %v217_v35 = vsel %vm37_vm1, %v211_v15, %v939_v1  ;;  %v231_v36 = vsel %vm37_vm1, %v225_v16, %v939_v1  ;;  %v189_v37 = vsel %vm37_vm1, %v183_v17, %v939_v1  ;;  %v770_v54 = vld [vmem:[%s1117_s1 + $0x8] sm:$0xff]   ;;  %v784_v5 = vld [vmem:[%s1117_s1 + $0x40] sm:$0xff]   ;;  %s757_s17 = sshll.u32 %s908_s16, 4  ;;  %s758_s17 = int_to_ptr.vmem [resolvable:$true] %s757_s17 }
   0xb   :  { %v275_v31 = vpack.c.bf16 %v907_v30, %v273_v26  ;;  %v289_v32 = vpack.c.bf16 %v907_v30, %v287_v27  ;;  %v247_v33 = vpack.c.bf16 %v907_v30, %v245_v28  ;;  %v261_v34 = vpack.c.bf16 %v907_v30, %v259_v29  ;;  %v71_v11 = vld [vmem:[%s1117_s1] sm:$0xff]   ;;  %p890_p1 = scmp.lt.s32.totalorder %s758_s17, %s758_s17 }
   0xc   :  { %v203_v38 = vsel %vm37_vm1, %v197_v19, %v939_v1  ;;  %v219_v39 = vpack.c.bf16 %v907_v30, %v217_v35  ;;  %v233_v40 = vpack.c.bf16 %v907_v30, %v231_v36  ;;  %v191_v41 = vpack.c.bf16 %v907_v30, %v189_v37  ;;  %v26_v12 = vld [vmem:[%s1119_s3] sm:$0xff]  }
   0xd   :  { %278 = vst [vmem:[#allocation15 + $0x38] sm:$0xf] %v275_v31  ;;  %292 = vst [vmem:[#allocation15 + $0x3c] sm:$0xf] %v289_v32  ;;  %v205_v42 = vpack.c.bf16 %v907_v30, %v203_v38  ;;  %v860_v45 = vld [vmem:[#allocation15 + $0x78] sm:$0xff]   ;;  %v448_v46 = vsel %vm37_vm1, %v442_v20, %v939_v1  ;;  %v471_v47 = vsel %vm37_vm1, %v465_v21, %v939_v1  ;;  %v127_v57 = vunpack.c.l.bf16 %v772_v43 }
   0xe   :  { %250 = vst [vmem:[#allocation15 + $0x30] sm:$0xf] %v247_v33  ;;  %264 = vst [vmem:[#allocation15 + $0x34] sm:$0xf] %v261_v34  ;;  %v161_v48 = vsel %vm37_vm1, %v155_v22, %v939_v1  ;;  %v175_v49 = vsel %vm37_vm1, %v169_v23, %v939_v1  ;;  %v450_v50 = vpack.c.bf16 %v907_v30, %v448_v46  ;;  %848 = vmatprep.subr.msk.bf16.mxu0 %vm649_vm0, %v860_v45  ;;  %v862_v6 = vld [vmem:[#allocation15 + $0x70] sm:$0xff]  }
   0xf   :  { %222 = vst [vmem:[#allocation15 + $0x28] sm:$0xf] %v219_v39  ;;  %236 = vst [vmem:[#allocation15 + $0x2c] sm:$0xf] %v233_v40  ;;  %v473_v51 = vpack.c.bf16 %v907_v30, %v471_v47  ;;  %v163_v52 = vpack.c.bf16 %v907_v30, %v161_v48  ;;  %v177_v53 = vpack.c.bf16 %v907_v30, %v175_v49  ;;  %v141_v58 = vunpack.c.h.bf16 %v772_v43  ;;  %v864_v40 = vld [vmem:[#allocation15 + $0x68] sm:$0xff]   ;;  %v866_v48 = vld [vmem:[#allocation15 + $0x60] sm:$0xff]  }
  0x10   :  { %194 = vst [vmem:[#allocation15 + $0x20] sm:$0xf] %v191_v41  ;;  %208 = vst [vmem:[#allocation15 + $0x24] sm:$0xf] %v205_v42  ;;  %v402_v55 = vsel %vm37_vm1, %v396_v24, %v939_v1  ;;  %v425_v56 = vsel %vm37_vm1, %v419_v25, %v939_v1  ;;  %v350_v61 = vunpack.c.l.bf16 %v786_v44  ;;  %v373_v62 = vunpack.c.h.bf16 %v786_v44 }
  0x11   :  { %453 = vst [vmem:[#allocation15 + $0x58] sm:$0xf] %v450_v50  ;;  %476 = vst [vmem:[#allocation15 + $0x5c] sm:$0xf] %v473_v51  ;;  %v404_v59 = vpack.c.bf16 %v907_v30, %v402_v55  ;;  %v427_v60 = vpack.c.bf16 %v907_v30, %v425_v56  ;;  %v133_v63 = vsel %vm37_vm1, %v127_v57, %v939_v1  ;;  %v99_v2 = vunpack.c.l.bf16 %v770_v54 }
  0x12   :  { %166 = vst [vmem:[#allocation15 + $0x18] sm:$0xf] %v163_v52  ;;  %180 = vst [vmem:[#allocation15 + $0x1c] sm:$0xf] %v177_v53  ;;  %v147_v0 = vsel %vm37_vm1, %v141_v58, %v939_v1  ;;  %v113_v4 = vunpack.c.h.bf16 %v770_v54  ;;  %v135_v7 = vpack.c.bf16 %v907_v30, %v133_v63  ;;  %v356_v9 = vsel %vm37_vm1, %v350_v61, %v939_v1 }
  0x13   :  { %407 = vst [vmem:[#allocation15 + $0x50] sm:$0xf] %v404_v59  ;;  %430 = vst [vmem:[#allocation15 + $0x54] sm:$0xf] %v427_v60  ;;  %v149_v8 = vpack.c.bf16 %v907_v30, %v147_v0  ;;  %v379_v10 = vsel %vm37_vm1, %v373_v62, %v939_v1  ;;  %v358_v15 = vpack.c.bf16 %v907_v30, %v356_v9  ;;  %v304_v21 = vunpack.c.l.bf16 %v784_v5  ;;  %v552_v62 = vld [vmem:[%s1116_s0] sm:$0x3] }
  0x14   :  { %v861_v13 = vld [vmem:[#allocation15 + $0x38] sm:$0xff]   ;;  %v381_v16 = vpack.c.bf16 %v907_v30, %v379_v10  ;;  %v105_v17 = vsel %vm37_vm1, %v99_v2, %v939_v1  ;;  %v119_v18 = vsel %vm37_vm1, %v113_v4, %v939_v1  ;;  %138 = vst [vmem:[#allocation15 + $0x10] sm:$0xf] %v135_v7  ;;  %v327_v22 = vunpack.c.h.bf16 %v784_v5  ;;  %s885_s0 = scalar_lea.vmem %s758_s17, 512 }
  0x15   :  { %152 = vst [vmem:[#allocation15 + $0x14] sm:$0xf] %v149_v8  ;;  %v107_v19 = vpack.c.bf16 %v907_v30, %v105_v17  ;;  %v121_v20 = vpack.c.bf16 %v907_v30, %v119_v18  ;;  %v675_v23 = vsel %vm649_vm0, %v861_v13, 0  ;;  %361 = vst [vmem:[#allocation15 + $0x48] sm:$0xf] %v358_v15  ;;  %v72_v24 = vunpack.c.l.bf16 %v71_v11  ;;  %v863_v29 = vld [vmem:[#allocation15 + $0x30] sm:$0xff]   ;;  %p886_p0 = scmp.ne.s32.totalorder %s758_s17, %s885_s0  ;;  %p891_p2 = scmp.lt.s32.totalorder %s885_s0, %s885_s0 }
  0x16   :  { %384 = vst [vmem:[#allocation15 + $0x4c] sm:$0xf] %v381_v16  ;;  %v85_v25 = vunpack.c.h.bf16 %v71_v11  ;;  %v27_v26 = vunpack.c.l.bf16 %v26_v12  ;;  %831 = vmatpush3.bf16.xpose.msra.mxu0 %v675_v23  ;;  %v310_v27 = vsel %vm37_vm1, %v304_v21, %v939_v1  ;;  %v333_v28 = vsel %vm37_vm1, %v327_v22, %v939_v1  ;;  %v865_v44 = vld [vmem:[#allocation15 + $0x28] sm:$0xff]  }
  0x17   :  { %110 = vst [vmem:[#allocation15 + $0x8] sm:$0xf] %v107_v19  ;;  %124 = vst [vmem:[#allocation15 + $0xc] sm:$0xf] %v121_v20  ;;  %849 = vmatprep.subr.msk.bf16.mxu0 %vm649_vm0, %v862_v6  ;;  %v312_v31 = vpack.c.bf16 %v907_v30, %v310_v27  ;;  %v335_v32 = vpack.c.bf16 %v907_v30, %v333_v28  ;;  %v78_v33 = vsel %vm37_vm1, %v72_v24, %v939_v1  ;;  %v867_v49 = vld [vmem:[#allocation15 + $0x20] sm:$0xff]   ;;  %p892_p3 = por %p891_p2, %p890_p1 }
  0x18   :  { %v79_v34 = vpack.c.bf16 %v907_v30, %v78_v33  ;;  %v91_v35 = vsel %vm37_vm1, %v85_v25, %v939_v1  ;;  %v38_v36 = vsel %vm37_vm1, %v27_v26, %v939_v1  ;;  %v57_v39 = vshrl.u32 %v34_v3, 7  ;;  %v868_v52 = vld [vmem:[#allocation15 + $0x58] sm:$0xff]  }
  0x19   :  { %315 = vst [vmem:[#allocation15 + $0x40] sm:$0xf] %v312_v31  ;;  %338 = vst [vmem:[#allocation15 + $0x44] sm:$0xf] %v335_v32  ;;  %v93_v37 = vpack.c.bf16 %v907_v30, %v91_v35  ;;  %v39_v38 = vpack.c.bf16 %v907_v30, %v38_v36  ;;  %v672_v41 = vsel %vm649_vm0, %v863_v29, 0  ;;  %v54_v42 = vunpack.c.h.bf16 %v26_v12  ;;  %p893_p4 = pnand %p892_p3, %p886_p0 }
  0x1a   :  { %82 = vst [vmem:[#allocation15] sm:$0xf] %v79_v34  ;;  %v58_v43 = vadd.s32 8, %v57_v39  ;;  %v669_v47 = vsel %vm649_vm0, %v865_v44, 0  ;;  %v666_v51 = vsel %vm649_vm0, %v867_v49, 0  ;;  %v556_v61 = vsub.s32 0, %v57_v39 }
  0x1b   :  { %96 = vst [vmem:[#allocation15 + $0x4] sm:$0xf] %v93_v37  ;;  %42 = vst [vmem:[#allocation14] sm:$0xf] %v39_v38  ;;  %v560_v63 = vsub.s32 1, %v57_v39 }
  0x1c   :  { %vm59_vm2 = vcmp.lt.s32.totalorder %v58_v43, 10  ;;  %v871_v53 = vld [vmem:[#allocation15 + $0x10] sm:$0xff]   ;;  %v557_v0 = vrot.slane %v552_v62, %v556_v61 }
  0x1d   :  { %v60_v45 = vsel %vm59_vm2, %v54_v42, %v939_v1  ;;  %v660_v54 = vsel %vm649_vm0, %v871_v53, 0  ;;  %v872_v55 = vld [vmem:[#allocation15 + $0x48] sm:$0xff]   ;;  %v561_v2 = vrot.slane %v552_v62, %v560_v63 }
  0x1e   :  { %833 = vmatpush3.bf16.xpose.msra.mxu0 %v672_v41  ;;  %v65_v46 = vsel %vm37_vm1, %v60_v45, %v939_v1  ;;  %v869_v1 = vld [vmem:[#allocation15 + $0x18] sm:$0xff]   ;;  %v873_v56 = vld [vmem:[#allocation15 + $0x8] sm:$0xff]  }
  0x1f   :  { %850 = vmatprep.subr.msk.bf16.mxu0 %vm649_vm0, %v864_v40  ;;  %v67_v3 = vpack.c.bf16 %v907_v30, %v65_v46  ;;  %v663_v14 = vsel %vm649_vm0, %v869_v1, 0  ;;  %v870_v30 = vld [vmem:[#allocation15 + $0x50] sm:$0xff]   ;;  %v657_v57 = vsel %vm649_vm0, %v873_v56, 0 }
  0x20   :  { %v874_v58 = vld [vmem:[#allocation15 + $0x40] sm:$0xff]  }
  0x21   :  { %70 = vst [vmem:[#allocation14 + $0x4] sm:$0xf] %v67_v3 }
  0x22   :  { %v875_v59 = vld [vmem:[#allocation15] sm:$0xff]  }
  0x23   :  { %v654_v60 = vsel %vm649_vm0, %v875_v59, 0 }
  0x26   :  { %835 = vmatpush3.bf16.xpose.msra.mxu0 %v669_v47 }
  0x27   :  { %851 = vmatprep.subr.msk.bf16.mxu0 %vm649_vm0, %v866_v48 }
  0x28   :  { %v876_v50 = vld [vmem:[#allocation14] sm:$0xff]  }
  0x29   :  { %846 = vmatprep.mubr.msk.bf16.mxu0 %vm649_vm0, %v876_v50 }
  0x2e   :  { %837 = vmatpush3.bf16.xpose.msra.mxu0 %v666_v51 }
  0x2f   :  { %852 = vmatprep.subr.msk.bf16.mxu0 %vm649_vm0, %v868_v52 }
  0x36   :  { %839 = vmatpush3.bf16.xpose.msra.mxu0 %v663_v14 }
  0x37   :  { %853 = vmatprep.subr.msk.bf16.mxu0 %vm649_vm0, %v870_v30 }
  0x3e   :  { %841 = vmatpush3.bf16.xpose.msra.mxu0 %v660_v54 }
  0x3f   :  { %854 = vmatprep.subr.msk.bf16.mxu0 %vm649_vm0, %v872_v55 }
  0x46   :  { %843 = vmatpush3.bf16.xpose.msra.mxu0 %v657_v57 }
  0x47   :  { %855 = vmatprep.subr.msk.bf16.mxu0 %vm649_vm0, %v874_v58 }
  0x4e   :  { %845 = vmatpush3.bf16.xpose.msra.mxu0 %v654_v60 }
  0x55   :  { %847 = vmatmul.mubr.msk.bf16.vlgmr.msra.gmra.mxu0 %vm649_vm0, %v876_v50 }
 0x115   :  { %v735_v4 = vpop.f32.mrf.mxu0 }
 0x116   :  { %v736_v5 = vadd.f32 %v735_v4, %v557_v0 }
 0x117   :  { %v737_v6 = vpop.f32.mrf.mxu0 }
 0x118   :  { %877 = vtanh.f32 %v736_v5  ;;  %v738_v7 = vadd.f32 %v737_v6, %v561_v2 }
 0x119   :  { %v739_v8 = vpop.f32.mrf.mxu0 }
 0x11a   :  { %879 = vtanh.f32 %v738_v7  ;;  %v740_v9 = vadd.f32 %v739_v8, %v557_v0 }
 0x11b   :  { %v741_v10 = vpop.f32.mrf.mxu0 }
 0x11c   :  { %881 = vtanh.f32 %v740_v9  ;;  %v742_v11 = vadd.f32 %v741_v10, %v561_v2 }
 0x11e   :  { %883 = vtanh.f32 %v742_v11 }
 0x125   :  { %v878_v12 = vpop.eup %877 }
 0x126   :  { %748 = vst [vmem:[#allocation12] sm:$0xff] %v878_v12 }
 0x127   :  { %v880_v13 = vpop.eup %879 }
 0x128   :  { %749 = vst [vmem:[#allocation12 + $0x8] sm:$0xff] %v880_v13 }
 0x129   :  { %v882_v15 = vpop.eup %881 }
 0x12a   :  { %750 = vst [vmem:[#allocation12 + $0x10] sm:$0xff] %v882_v15 }
 0x12b   :  { %v884_v16 = vpop.eup %883 }
 0x12c   :  { %751 = vst [vmem:[#allocation12 + $0x18] sm:$0xff] %v884_v16 }
 0x12d   :  { %896 = shalt.err (!%p893_p4)
}
 0x12e   :  { %s909_s18 = smov 256   ;;  %s910_s19 = smov 16  }
 0x12f   :  { %763 = dma.vmem_to_hbm [thread:$0]  %s758_s17, 512, %s1120_s4, [#allocation13], %s909_s18, %s909_s18, %s910_s19  }
 0x130   :  { %905 = dma.done.wait [#allocation13], 512  }
 0x131   :  { %906 = vsyncadd [#allocation13], 4294966784 }
 0x132   :  { %767 = vsyncpa [#allocation13], 1 }

</bundles_post_ra>
